<compile_context>
chip_gen: v7x
topology: tpu7x:2x2x1
jax: 0.10.0
libtpu: 0.0.40
codegen_flags: <defaults>
</compile_context>

<pallas_src>
import functools

import jax
import jax.numpy as jnp
from jax.experimental import pallas as pl
from jax.experimental.pallas import tpu as pltpu

LANES = 128
MAX_BLOCK_BYTES = 4 * 1024 * 1024   # per input, per pipeline buffer
MIN_SPLIT_ROWS = 2048               # force >= 2 grid steps above this many rows


def _round_up(x: int, m: int) -> int:
    return ((x + m - 1) // m) * m


def _min_sublanes(*dtypes) -> int:
    # Minimum second-minor tile: 8 for 32-bit, 16 for 16-bit, 32 for 8-bit dtypes.
    return max(max(8, 32 // jnp.dtype(d).itemsize) for d in dtypes)


def _poly1_elementwise(p, t, alpha):
    """Elementwise binary Poly-1 loss, computed in f32 registers."""
    log_p = jnp.maximum(jnp.log(p), -100.0)
    log_1mp = jnp.maximum(jnp.log(1.0 - p), -100.0)
    bce = -(t * log_p + (1.0 - t) * log_1mp)
    pt = t * p + (1.0 - t) * (1.0 - p)
    return bce + alpha * (1.0 - pt)


def _poly1_elt_kernel(pred_ref, tgt_ref, out_ref, *, alpha):
    """reduction='none': store the elementwise loss in the output dtype."""
    p = pred_ref[...].astype(jnp.float32)
    t = tgt_ref[...].astype(jnp.float32)
    # Any padded rows of a ragged last block are dropped by the partial-block
    # writeback, so no masking is needed here.
    out_ref[...] = _poly1_elementwise(p, t, alpha).astype(out_ref.dtype)


def _poly1_sum_kernel(pred_ref, tgt_ref, psum_ref, *, alpha):
    """'mean'/'sum', fully aligned grid: per-block (1, 1, 128) partial sums."""
    p = pred_ref[...].astype(jnp.float32)
    t = tgt_ref[...].astype(jnp.float32)
    loss = _poly1_elementwise(p, t, alpha)
    psum_ref[...] = jnp.sum(loss, axis=0, keepdims=True)[None]


def _poly1_sum_kernel_masked(pred_ref, tgt_ref, psum_ref, *, alpha, total_rows):
    """'mean'/'sum' with a ragged last row-block: mask padded rows there only."""
    i = pl.program_id(0)
    block_rows = pred_ref.shape[0]
    p = pred_ref[...].astype(jnp.float32)
    t = tgt_ref[...].astype(jnp.float32)
    loss = _poly1_elementwise(p, t, alpha)
    last = pl.num_programs(0) - 1

    @pl.when(i < last)
    def _():
        # Interior blocks are fully valid: plain sublane reduce, no mask.
        psum_ref[...] = jnp.sum(loss, axis=0, keepdims=True)[None]

    @pl.when(i == last)
    def _():
        # Only the last block can hold Pallas-padded garbage rows.  Compare row
        # indices only (no flat index -> no int32 overflow for huge inputs).
        valid_rows = total_rows - i * block_rows
        row_idx = jax.lax.broadcasted_iota(jnp.int32, loss.shape, 0)
        masked = jnp.where(row_idx < valid_rows, loss, 0.0)
        psum_ref[...] = jnp.sum(masked, axis=0, keepdims=True)[None]


def _choose_block_rows(rows: int, min_sub: int, itemsize: int) -> int:
    max_rows = max(min_sub,
                   (MAX_BLOCK_BYTES // (LANES * itemsize)) // min_sub * min_sub)
    block_rows = min(max_rows, _round_up(rows, min_sub))
    # v7x megacore: keep at least 2 grid steps when the slab is large enough
    # that one extra ~0.35us grid step is negligible next to the DMA it buys.
    if rows >= MIN_SPLIT_ROWS and pl.cdiv(rows, block_rows) < 2:
        block_rows = _round_up(pl.cdiv(rows, 2), min_sub)
    return block_rows


def binary_poly1_loss(prediction, target, alpha=1.0, reduction="mean"):
    if prediction.shape != target.shape:
        raise ValueError("prediction and target must have the same shape")
    if reduction not in ("none", "mean", "sum"):
        raise ValueError(f"Incorrect reduction: {reduction}")

    alpha = float(alpha)
    orig_shape = prediction.shape
    n = int(prediction.size)
    out_dtype = prediction.dtype

    if n == 0:
        if reduction == "none":
            return jnp.zeros(orig_shape, out_dtype)
        return jnp.array(0.0 if reduction == "sum" else jnp.nan, jnp.float32)

    pred_flat = prediction.reshape(-1)
    tgt_flat = target.reshape(-1)

    n_bulk = (n // LANES) * LANES
    tail = n - n_bulk

    # <128-element ragged tail handled with a tiny jnp expression, so we never
    # pad/copy the full inputs or slice the full output in the wrapper.
    tail_loss = None
    if tail:
        tail_loss = _poly1_elementwise(
            pred_flat[n_bulk:].astype(jnp.float32),
            tgt_flat[n_bulk:].astype(jnp.float32),
            alpha,
        )

    rows = n_bulk // LANES
    if rows == 0:
        # Entire input is smaller than one 128-lane row: pure jnp.
        if reduction == "none":
            return tail_loss.astype(out_dtype).reshape(orig_shape)
        total = jnp.sum(tail_loss)
        return total if reduction == "sum" else total / n

    pred2d = (pred_flat[:n_bulk] if tail else pred_flat).reshape(rows, LANES)
    tgt2d = (tgt_flat[:n_bulk] if tail else tgt_flat).reshape(rows, LANES)

    pred_item = jnp.dtype(prediction.dtype).itemsize
    tgt_item = jnp.dtype(target.dtype).itemsize
    min_sub = _min_sublanes(prediction.dtype, target.dtype)
    block_rows = _choose_block_rows(rows, min_sub, max(pred_item, tgt_item))
    num_blocks = pl.cdiv(rows, block_rows)
    aligned = (rows % block_rows) == 0

    in_specs = [
        pl.BlockSpec((block_rows, LANES), lambda i: (i, 0)),
        pl.BlockSpec((block_rows, LANES), lambda i: (i, 0)),
    ]

    in_buf_bytes = 2 * block_rows * LANES * (pred_item + tgt_item)  # double-buffered
    if reduction == "none":
        out_buf_bytes = 2 * block_rows * LANES * jnp.dtype(out_dtype).itemsize
        out_hbm_bytes = n_bulk * jnp.dtype(out_dtype).itemsize
    else:
        out_buf_bytes = 2 * LANES * 4
        out_hbm_bytes = num_blocks * LANES * 4

    # Scoped VMEM sized to the actual pipeline buffers + headroom for the f32
    # elementwise temporaries, kept below v7x's 64 MiB physical VMEM.
    vmem_limit = int(min(56 << 20,
                         max(32 << 20, in_buf_bytes + out_buf_bytes + (16 << 20))))
    compiler_params = pltpu.CompilerParams(
        dimension_semantics=("parallel",),
        vmem_limit_bytes=vmem_limit,
    )
    cost = pl.CostEstimate(
        flops=12 * n_bulk,
        transcendentals=2 * n_bulk,
        bytes_accessed=n_bulk * (pred_item + tgt_item) + out_hbm_bytes,
    )

    if reduction == "none":
        kernel = functools.partial(_poly1_elt_kernel, alpha=alpha)
        out2d = pl.pallas_call(
            kernel,
            out_shape=jax.ShapeDtypeStruct((rows, LANES), out_dtype),
            grid=(num_blocks,),
            in_specs=in_specs,
            out_specs=pl.BlockSpec((block_rows, LANES), lambda i: (i, 0)),
            compiler_params=compiler_params,
            cost_estimate=cost,
        )(pred2d, tgt2d)
        out_flat = out2d.reshape(-1)
        if tail:
            out_flat = jnp.concatenate([out_flat, tail_loss.astype(out_dtype)])
        return out_flat.reshape(orig_shape)

    # 'mean' / 'sum': sum-only kernel, per-block partial sums, no elementwise store.
    if aligned:
        kernel = functools.partial(_poly1_sum_kernel, alpha=alpha)
    else:
        kernel = functools.partial(_poly1_sum_kernel_masked, alpha=alpha,
                                   total_rows=rows)
    partials = pl.pallas_call(
        kernel,
        out_shape=jax.ShapeDtypeStruct((num_blocks, 1, LANES), jnp.float32),
        grid=(num_blocks,),
        in_specs=in_specs,
        out_specs=pl.BlockSpec((1, 1, LANES), lambda i: (i, 0, 0)),
        compiler_params=compiler_params,
        cost_estimate=cost,
    )(pred2d, tgt2d)
    total = jnp.sum(partials)
    if tail:
        total = total + jnp.sum(tail_loss)
    # Reductions are accumulated and returned in f32 (identical for f32 inputs).
    return total if reduction == "sum" else total / n


class BinaryPoly1Loss:
    """JAX/Pallas port of karbonn.modules.BinaryPoly1Loss (forward only)."""
    # TODO(synk): backward/autograd of the fused kernel is not implemented (forward-only port).

    def __init__(self, alpha: float = 1.0, reduction: str = "mean") -> None:
        if reduction not in ("none", "mean", "sum"):
            raise ValueError(f"Incorrect reduction: {reduction}")
        self._alpha = float(alpha)
        self.reduction = reduction

    def __call__(self, prediction, target):
        return binary_poly1_loss(prediction=prediction, target=target,
                                 alpha=self._alpha, reduction=self.reduction)


def _reference(prediction, target, alpha=1.0, reduction="mean"):
    p = prediction.astype(jnp.float32)
    t = target.astype(jnp.float32)
    bce = -(t * jnp.maximum(jnp.log(p), -100.0)
            + (1.0 - t) * jnp.maximum(jnp.log(1.0 - p), -100.0))
    pt = t * p + (1.0 - t) * (1.0 - p)
    loss = bce + alpha * (1.0 - pt)
    if reduction == "none":
        return loss
    if reduction == "sum":
        return loss.sum()
    return loss.mean()


if __name__ == "__main__":
    key = jax.random.PRNGKey(0)
    keys = jax.random.split(key, 10)

    # Primary inputs: probabilities in (0, 1), binary targets, shape (2, 4, 16, 16).
    prediction = jax.random.uniform(keys[0], (2, 4, 16, 16), dtype=jnp.float32,
                                    minval=1e-3, maxval=1.0 - 1e-3)
    target = jax.random.bernoulli(keys[1], 0.5, (2, 4, 16, 16)).astype(jnp.float32)

    loss = BinaryPoly1Loss(alpha=1.0, reduction="mean")(prediction, target)
    jax.block_until_ready(loss)
    ref = _reference(prediction, target, 1.0, "mean")
    assert jnp.allclose(loss, ref, rtol=1e-5, atol=1e-5), (loss, ref)

    loss_none = BinaryPoly1Loss(alpha=1.0, reduction="none")(prediction, target)
    jax.block_until_ready(loss_none)
    ref_none = _reference(prediction, target, 1.0, "none")
    assert loss_none.shape == prediction.shape
    assert jnp.allclose(loss_none, ref_none, rtol=1e-5, atol=1e-5)

    loss_sum = BinaryPoly1Loss(alpha=1.0, reduction="sum")(prediction, target)
    jax.block_until_ready(loss_sum)
    ref_sum = _reference(prediction, target, 1.0, "sum")
    assert jnp.allclose(loss_sum, ref_sum, rtol=1e-5, atol=1e-3), (loss_sum, ref_sum)

    # Tiny ragged case (n < 128): pure-jnp tail path.
    pred_odd = jax.random.uniform(keys[2], (3, 37), dtype=jnp.float32,
                                  minval=1e-3, maxval=1.0 - 1e-3)
    tgt_odd = jax.random.bernoulli(keys[3], 0.5, (3, 37)).astype(jnp.float32)
    loss_odd = BinaryPoly1Loss(alpha=0.7, reduction="mean")(pred_odd, tgt_odd)
    jax.block_until_ready(loss_odd)
    ref_odd = _reference(pred_odd, tgt_odd, 0.7, "mean")
    assert jnp.allclose(loss_odd, ref_odd, rtol=1e-5, atol=1e-5), (loss_odd, ref_odd)

    # Ragged bulk+tail case (n=1500): masked sum kernel (partial last row-block)
    # and the 'none' bulk + tail concat path.
    pred_rag = jax.random.uniform(keys[4], (5, 300), dtype=jnp.float32,
                                  minval=1e-3, maxval=1.0 - 1e-3)
    tgt_rag = jax.random.bernoulli(keys[5], 0.5, (5, 300)).astype(jnp.float32)
    loss_rag = BinaryPoly1Loss(alpha=0.3, reduction="mean")(pred_rag, tgt_rag)
    jax.block_until_ready(loss_rag)
    ref_rag = _reference(pred_rag, tgt_rag, 0.3, "mean")
    assert jnp.allclose(loss_rag, ref_rag, rtol=1e-5, atol=1e-5), (loss_rag, ref_rag)

    loss_rag_none = BinaryPoly1Loss(alpha=0.3, reduction="none")(pred_rag, tgt_rag)
    jax.block_until_ready(loss_rag_none)
    ref_rag_none = _reference(pred_rag, tgt_rag, 0.3, "none")
    assert loss_rag_none.shape == pred_rag.shape
    assert jnp.allclose(loss_rag_none, ref_rag_none, rtol=1e-5, atol=1e-5)

    # Multi-block case (rows=4096 -> 2 "parallel" grid steps): aligned sum kernel.
    pred_big = jax.random.uniform(keys[6], (2, 4, 512, 128), dtype=jnp.float32,
                                  minval=1e-3, maxval=1.0 - 1e-3)
    tgt_big = jax.random.bernoulli(keys[7], 0.5, (2, 4, 512, 128)).astype(jnp.float32)
    loss_big = BinaryPoly1Loss(alpha=1.0, reduction="sum")(pred_big, tgt_big)
    jax.block_until_ready(loss_big)
    ref_big = _reference(pred_big, tgt_big, 1.0, "sum")
    assert jnp.allclose(loss_big, ref_big, rtol=5e-4), (loss_big, ref_big)

    # bf16 inputs: exercises the dtype-aware sublane-tile rounding (min tile 16).
    pred_bf = jax.random.uniform(keys[8], (32, 128), dtype=jnp.float32,
                                 minval=1e-3, maxval=1.0 - 1e-3).astype(jnp.bfloat16)
    tgt_bf = jax.random.bernoulli(keys[9], 0.5, (32, 128)).astype(jnp.bfloat16)
    loss_bf = BinaryPoly1Loss(alpha=0.5, reduction="mean")(pred_bf, tgt_bf)
    jax.block_until_ready(loss_bf)
    ref_bf = _reference(pred_bf, tgt_bf, 0.5, "mean")
    assert jnp.allclose(loss_bf, ref_bf, rtol=1e-3, atol=1e-3), (loss_bf, ref_bf)

    print("KERNEL_OK")
</pallas_src>

<mosaic_0001>
module attributes {stable_mosaic.version = 11 : i64} {
  func.func @_poly1_sum_kernel(%arg0: i32, %arg1: memref<16x128xf32, #tpu.memory_space<vmem>>, %arg2: memref<16x128xf32, #tpu.memory_space<vmem>>, %arg3: memref<1x1x128xf32, #tpu.memory_space<vmem>>) attributes {dimension_semantics = [#tpu.dimension_semantics<parallel>], iteration_bounds = array<i64: 1>, scalar_prefetch = 0 : i64, scratch_operands = 0 : i64, tpu.core_type = #tpu.core_type<tc>, window_params = [{transform_indices = @transform_0, window_bounds = array<i64: 16, 128>}, {transform_indices = @transform_1, window_bounds = array<i64: 16, 128>}, {transform_indices = @transform_2, window_bounds = array<i64: 1, 1, 128>}]} {
    %c0 = arith.constant 0 : index
    %c0_0 = arith.constant 0 : index
    %0 = vector.load %arg1[%c0, %c0_0] : memref<16x128xf32, #tpu.memory_space<vmem>>, vector<16x128xf32>
    %c0_1 = arith.constant 0 : index
    %c0_2 = arith.constant 0 : index
    %1 = vector.load %arg2[%c0_1, %c0_2] : memref<16x128xf32, #tpu.memory_space<vmem>>, vector<16x128xf32>
    %2 = math.log %0 : vector<16x128xf32>
    %cst = arith.constant -1.000000e+02 : f32
    %3 = vector.broadcast %cst : f32 to vector<16x128xf32>
    %4 = arith.maximumf %2, %3 : vector<16x128xf32>
    %cst_3 = arith.constant 1.000000e+00 : f32
    %5 = vector.broadcast %cst_3 : f32 to vector<16x128xf32>
    %6 = arith.subf %5, %0 : vector<16x128xf32>
    %7 = math.log %6 : vector<16x128xf32>
    %cst_4 = arith.constant -1.000000e+02 : f32
    %8 = vector.broadcast %cst_4 : f32 to vector<16x128xf32>
    %9 = arith.maximumf %7, %8 : vector<16x128xf32>
    %10 = arith.mulf %1, %4 : vector<16x128xf32>
    %cst_5 = arith.constant 1.000000e+00 : f32
    %11 = vector.broadcast %cst_5 : f32 to vector<16x128xf32>
    %12 = arith.subf %11, %1 : vector<16x128xf32>
    %13 = arith.mulf %12, %9 : vector<16x128xf32>
    %14 = arith.addf %10, %13 : vector<16x128xf32>
    %cst_6 = arith.constant 0.000000e+00 : f32
    %15 = vector.broadcast %cst_6 : f32 to vector<16x128xf32>
    %16 = arith.subf %15, %14 : vector<16x128xf32>
    %17 = arith.mulf %1, %0 : vector<16x128xf32>
    %cst_7 = arith.constant 1.000000e+00 : f32
    %18 = vector.broadcast %cst_7 : f32 to vector<16x128xf32>
    %19 = arith.subf %18, %1 : vector<16x128xf32>
    %cst_8 = arith.constant 1.000000e+00 : f32
    %20 = vector.broadcast %cst_8 : f32 to vector<16x128xf32>
    %21 = arith.subf %20, %0 : vector<16x128xf32>
    %22 = arith.mulf %19, %21 : vector<16x128xf32>
    %23 = arith.addf %17, %22 : vector<16x128xf32>
    %cst_9 = arith.constant 1.000000e+00 : f32
    %24 = vector.broadcast %cst_9 : f32 to vector<16x128xf32>
    %25 = arith.subf %24, %23 : vector<16x128xf32>
    %cst_10 = arith.constant 1.000000e+00 : f32
    %26 = vector.broadcast %cst_10 : f32 to vector<16x128xf32>
    %27 = arith.mulf %26, %25 : vector<16x128xf32>
    %28 = arith.addf %16, %27 : vector<16x128xf32>
    %cst_11 = arith.constant dense<0.000000e+00> : vector<128xf32>
    %29 = vector.multi_reduction <add>, %28, %cst_11 [0] : vector<16x128xf32> to vector<128xf32>
    %30 = vector.shape_cast %29 : vector<128xf32> to vector<1x128xf32>
    %31 = vector.shape_cast %30 : vector<1x128xf32> to vector<1x1x128xf32>
    %c0_12 = arith.constant 0 : index
    %c0_13 = arith.constant 0 : index
    %c0_14 = arith.constant 0 : index
    %32 = vector.load %arg3[%c0_12, %c0_13, %c0_14] : memref<1x1x128xf32, #tpu.memory_space<vmem>>, vector<1x1x128xf32>
    tpu.vector_store %arg3[%c0_12, %c0_13, %c0_14], %31 {strides = array<i32>} : memref<1x1x128xf32, #tpu.memory_space<vmem>>, vector<1x1x128xf32>,
    return
  }
  func.func @transform_0(%arg0: i32) -> (i32, i32) {
    %c0_i32 = arith.constant 0 : i32
    %c0_i32_0 = arith.constant 0 : i32
    return %arg0, %c0_i32 : i32, i32
  }
  func.func @transform_1(%arg0: i32) -> (i32, i32) {
    %c0_i32 = arith.constant 0 : i32
    %c0_i32_0 = arith.constant 0 : i32
    return %arg0, %c0_i32 : i32, i32
  }
  func.func @transform_2(%arg0: i32) -> (i32, i32, i32) {
    %c0_i32 = arith.constant 0 : i32
    %c0_i32_0 = arith.constant 0 : i32
    %c0_i32_1 = arith.constant 0 : i32
    return %arg0, %c0_i32, %c0_i32_0 : i32, i32, i32
  }
}

</mosaic_0001>

<bundles_post_ra>
// kernel: tpu_custom_call.1
= control target key start
LH: loop header
LB: loop body
LE: loop exit
PB: predicated region body
PF: predicated region fallthrough
CT: control target
= control target key end

     0   :  { %7 = vsyncpa [#allocation3], 0  ;;  %s243_s0 = inlined_call_operand.hbm [shape: f32[16,128], index: 0, kind: input, shape index: {}]   ;;  %s244_s1 = inlined_call_operand.hbm [shape: f32[16,128], index: 1, kind: input, shape index: {}]   ;;  %s245_s2 = inlined_call_operand.hbm [shape: f32[1,1,128], index: 2, kind: output, shape index: {}]  }
   0x1   :  { %8 = vsyncpa [#allocation6], 0 }
   0x2   :  { %9 = vsyncpa [#allocation4], 0  ;;  %s187_s9 = smov [#allocation2]   ;;  %s115_s13 = scalar_lea.hbm %s243_s0, 256 }
   0x3   :  { %s15_s10 = sshll.u32 %s187_s9, 4  ;;  %p116_p0 = scmp.ne.s32.totalorder %s243_s0, %s115_s13  ;;  %s16_s10 = int_to_ptr.vmem [resolvable:$true] %s15_s10 }
   0x4   :  { %p119_p1 = scmp.lt.u32.totalorder %s115_s13, %s243_s0 }
   0x6   :  { %p121_p2 = pnand %p119_p1, %p116_p0 }
   0x8   :  { %124 = shalt.err (!%p121_p2)
}
   0x9   :  { %s125_s18 = scalar_lea.vmem %s16_s10, 256  ;;  %p130_p4 = scmp.lt.s32.totalorder %s16_s10, %s16_s10 }
   0xa   :  { %p126_p3 = scmp.ne.s32.totalorder %s16_s10, %s125_s18  ;;  %p131_p5 = scmp.lt.s32.totalorder %s125_s18, %s125_s18 }
   0xc   :  { %p132_p6 = por %p131_p5, %p130_p4 }
   0xe   :  { %p133_p7 = pnand %p132_p6, %p126_p3 }
  0x10   :  { %136 = shalt.err (!%p133_p7)
}
  0x11   :  { %s188_s19 = smov 128   ;;  %s189_s20 = smov 8  }
  0x12   :  { %21 = dma.hbm_to_vmem [thread:$0]  %s243_s0, 256, %s16_s10, [#allocation3], %s188_s19, %s188_s19, %s189_s20  }
  0x13   :  { %s190_s23 = smov [#allocation5]   ;;  %s137_s27 = scalar_lea.hbm %s244_s1, 256 }
  0x14   :  { %s27_s24 = sshll.u32 %s190_s23, 4  ;;  %p138_p8 = scmp.ne.s32.totalorder %s244_s1, %s137_s27  ;;  %s28_s24 = int_to_ptr.vmem [resolvable:$true] %s27_s24 }
  0x15   :  { %p141_p9 = scmp.lt.u32.totalorder %s137_s27, %s244_s1 }
  0x17   :  { %p143_p10 = pnand %p141_p9, %p138_p8 }
  0x19   :  { %146 = shalt.err (!%p143_p10)
}
  0x1a   :  { %s147_s4 = scalar_lea.vmem %s28_s24, 256  ;;  %p152_p12 = scmp.lt.s32.totalorder %s28_s24, %s28_s24 }
  0x1b   :  { %p148_p11 = scmp.ne.s32.totalorder %s28_s24, %s147_s4  ;;  %p153_p13 = scmp.lt.s32.totalorder %s147_s4, %s147_s4 }
  0x1d   :  { %p154_p0 = por %p153_p13, %p152_p12 }
  0x1f   :  { %p155_p1 = pnand %p154_p0, %p148_p11 }
  0x21   :  { %158 = shalt.err (!%p155_p1)
}
  0x22   :  { %33 = dma.hbm_to_vmem [thread:$0]  %s244_s1, 256, %s28_s24, [#allocation6], %s188_s19, %s188_s19, %s189_s20  }
  0x23   :  { %181 = dma.done.wait [#allocation3], 256  }
  0x24   :  { %182 = vsyncadd [#allocation3], 4294967040 }
  0x25   :  { %183 = dma.done.wait [#allocation6], 256  }
  0x26   :  { %184 = vsyncadd [#allocation6], 4294967040  ;;  %v40_v0 = vld [vmem:[#allocation2] sm:$0xff]  ;;  %v41_v1 = vld [vmem:[#allocation2 + $0x8] sm:$0xff]  ;;  %s191_s1 = smov [#allocation7]  }
  0x27   :  { %107 = vlog2.f32 %v40_v0  ;;  %v50_v2 = vsub.f32 1.0, %v40_v0  ;;  %v51_v3 = vsub.f32 1.0, %v41_v1  ;;  %v42_v4 = vld [vmem:[#allocation5] sm:$0xff]  ;;  %v43_v5 = vld [vmem:[#allocation5 + $0x8] sm:$0xff]  ;;  %s92_s6 = sshll.u32 %s191_s1, 4  ;;  %s93_s6 = int_to_ptr.vmem [resolvable:$true] %s92_s6 }
  0x28   :  { %109 = vlog2.f32 %v41_v1  ;;  %v60_v6 = vsub.f32 1.0, %v42_v4  ;;  %v61_v7 = vsub.f32 1.0, %v43_v5  ;;  %v68_v11 = vmul.f32 %v42_v4, %v40_v0  ;;  %s159_s7 = scalar_lea.vmem %s93_s6, 16  ;;  %s163_s8 = scalar_lea.vmem %s93_s6, 32 }
  0x29   :  { %111 = vlog2.f32 %v50_v2  ;;  %v69_v15 = vmul.f32 %v43_v5, %v41_v1  ;;  %p160_p2 = scmp.ne.s32.totalorder %s93_s6, %s159_s7  ;;  %p164_p3 = scmp.lt.s32.totalorder %s93_s6, %s93_s6 }
  0x2a   :  { %113 = vlog2.f32 %v51_v3  ;;  %v70_v12 = vmul.f32 %v60_v6, %v50_v2  ;;  %v71_v16 = vmul.f32 %v61_v7, %v51_v3  ;;  %p165_p4 = scmp.lt.s32.totalorder %s163_s8, %s159_s7 }
  0x2c   :  { %v72_v24 = vadd.f32 %v70_v12, %v68_v11  ;;  %v73_v27 = vadd.f32 %v71_v16, %v69_v15  ;;  %p166_p5 = por %p165_p4, %p164_p3 }
  0x2e   :  { %v74_v31 = vsub.f32 1.0, %v72_v24  ;;  %v75_v33 = vsub.f32 1.0, %v73_v27  ;;  %p167_p6 = pnand %p166_p5, %p160_p2 }
  0x31   :  { %v108_v8 = vpop.eup %107 }
  0x32   :  { %v110_v9 = vpop.eup %109  ;;  %v45_v10 = vmul.f32 0.6931472, %v108_v8 }
  0x33   :  { %v112_v13 = vpop.eup %111  ;;  %v47_v14 = vmul.f32 0.6931472, %v110_v9 }
  0x34   :  { %v114_v17 = vpop.eup %113  ;;  %v48_v18 = vmax.f32 %v45_v10, -100.0  ;;  %v53_v19 = vmul.f32 0.6931472, %v112_v13 }
  0x35   :  { %v49_v20 = vmax.f32 %v47_v14, -100.0  ;;  %v55_v21 = vmul.f32 0.6931472, %v114_v17 }
  0x36   :  { %v56_v22 = vmax.f32 %v53_v19, -100.0  ;;  %v58_v23 = vmul.f32 %v48_v18, %v42_v4 }
  0x37   :  { %v57_v25 = vmax.f32 %v55_v21, -100.0  ;;  %v59_v26 = vmul.f32 %v49_v20, %v43_v5 }
  0x38   :  { %v62_v28 = vmul.f32 %v60_v6, %v56_v22 }
  0x39   :  { %v63_v29 = vmul.f32 %v61_v7, %v57_v25 }
  0x3a   :  { %v64_v30 = vadd.f32 %v62_v28, %v58_v23 }
  0x3b   :  { %v65_v32 = vadd.f32 %v63_v29, %v59_v26 }
  0x3c   :  { %v66_v34 = vsub.f32 0.0, %v64_v30 }
  0x3d   :  { %v67_v35 = vsub.f32 0.0, %v65_v32 }
  0x3e   :  { %v76_v36 = vadd.f32 %v74_v31, %v66_v34 }
  0x3f   :  { %v77_v37 = vadd.f32 %v75_v33, %v67_v35 }
  0x41   :  { %v78_v38 = vadd.f32 %v77_v37, %v76_v36 }
  0x43   :  { %v79_v39 = vrot.slane %v78_v38, 4 }
  0x45   :  { %v80_v40 = vadd.f32 %v79_v39, %v78_v38 }
  0x47   :  { %v81_v41 = vrot.slane %v80_v40, 2 }
  0x49   :  { %v82_v42 = vadd.f32 %v81_v41, %v80_v40 }
  0x4b   :  { %v83_v43 = vrot.slane %v82_v42, 1 }
  0x4d   :  { %v84_v44 = vadd.f32 %v83_v43, %v82_v42 }
  0x4f   :  { %85 = vst [vmem:[#allocation7] sm:$0x1] %v84_v44 }
  0x50   :  { %170 = shalt.err (!%p167_p6)
}
  0x51   :  { %s171_s11 = scalar_lea.hbm %s245_s2, 16 }
  0x52   :  { %p172_p7 = scmp.ne.s32.totalorder %s245_s2, %s171_s11  ;;  %p175_p8 = scmp.lt.u32.totalorder %s171_s11, %s245_s2 }
  0x54   :  { %p177_p9 = pnand %p175_p8, %p172_p7 }
  0x56   :  { %180 = shalt.err (!%p177_p9)
}
  0x57   :  { %95 = dma.vmem_to_hbm [thread:$0]  %s93_s6, 16, %s245_s2, [#allocation4]  }
  0x58   :  { %185 = dma.done.wait [#allocation4], 16  }
  0x59   :  { %186 = vsyncadd [#allocation4], 4294967280 }
  0x5a   :  { %99 = vsyncpa [#allocation3], 1 }
  0x5b   :  { %100 = vsyncpa [#allocation6], 1 }
  0x5c   :  { %101 = vsyncpa [#allocation4], 1 }

</bundles_post_ra>
